<compile_context>
chip_gen: v6e
topology: v6e:2x2x1
jax: 0.10.0
libtpu: 0.0.40
codegen_flags: <defaults>
</compile_context>

<pallas_src>
import math
from functools import partial

import numpy as np
import jax
import jax.numpy as jnp
from jax import lax
from jax.experimental import pallas as pl
from jax.experimental.pallas import tpu as pltpu


# ---------------------------------------------------------------------------
# Stage 1: RMSNorm -> QKV projection -> RoPE -> head-major q/k/v (bf16)
#          grid = (B, S // block_qkv)
# ---------------------------------------------------------------------------
def _qkv_rope_kernel(x_ref, cos_ref, sin_ref, wqkv_ref, ga_ref,
                     q_ref, k_ref, v_ref, *, n_heads, head_dim, eps, q_scale):
    ts, D = x_ref.shape[1], x_ref.shape[2]
    x = x_ref[0].astype(jnp.float32)                          # (ts, D)

    # RMSNorm stays f32; operands are downcast only at the matmul.
    ms = jnp.mean(x * x, axis=-1, keepdims=True)
    h = x * lax.rsqrt(ms + eps) * ga_ref[...]

    qkv = jnp.dot(h.astype(jnp.bfloat16), wqkv_ref[...],
                  preferred_element_type=jnp.float32)         # (ts, 3D) f32 acc
    # Fold the attention scale into q here (RoPE is linear, so it commutes);
    # stage 2's inner loop then has no per-score multiply.
    q = qkv[:, :D] * q_scale
    k = qkv[:, D:2 * D]
    v = qkv[:, 2 * D:]

    # Full-width RoPE tables arrive as (ts, D); sin is pre-signed on the host
    # (-sin on even lanes, +sin on odd) so no in-kernel sign/concat work.
    cos = cos_ref[...]
    sin = sin_ref[...]

    lane = lax.broadcasted_iota(jnp.int32, (ts, D), 1)
    is_even = (lane % 2) == 0

    def rope(t):
        # Interleaved-pair swap: even lane picks t[i+1], odd lane picks t[i-1].
        # Static-shift rolls lower to lane rotations on Mosaic.
        nxt = jnp.roll(t, -1, axis=-1)
        prv = jnp.roll(t, 1, axis=-1)
        swapped = jnp.where(is_even, nxt, prv)
        return t * cos + swapped * sin

    q_r, k_r = rope(q), rope(k)

    # Emit head-major (B, H, S, hd) directly; removes the XLA transpose pass.
    for hh in range(n_heads):
        sl = slice(hh * head_dim, (hh + 1) * head_dim)
        q_ref[0, hh] = q_r[:, sl].astype(q_ref.dtype)
        k_ref[0, hh] = k_r[:, sl].astype(k_ref.dtype)
        v_ref[0, hh] = v[:, sl].astype(v_ref.dtype)


# ---------------------------------------------------------------------------
# Stage 2: causal flash attention (KV streamed from HBM, double-buffered)
#          + out-proj + residual + fused MLP        grid = (B, S // block_q)
# ---------------------------------------------------------------------------
def _attn_mlp_kernel(x_ref, q_ref, k_hbm, v_hbm, wout_ref, w1_ref, w2_ref, gm_ref,
                     o_ref, kbuf, vbuf, sem, *, n_heads, head_dim, block_q,
                     block_k, eps):
    b = pl.program_id(0)
    qi = pl.program_id(1)
    H, hd, tq, tk = n_heads, head_dim, block_q, block_k
    D = H * hd

    q = q_ref[0]                                              # (H, tq, hd) bf16, pre-scaled

    # --- manual double-buffered KV streaming (bounds VMEM at 2 tiles and
    #     never fetches tiles above the causal diagonal) ---
    def fetch(j, slot):
        start = pl.multiple_of(j * tk, tk)
        pltpu.make_async_copy(k_hbm.at[b, :, pl.ds(start, tk), :],
                              kbuf.at[slot], sem.at[0, slot]).start()
        pltpu.make_async_copy(v_hbm.at[b, :, pl.ds(start, tk), :],
                              vbuf.at[slot], sem.at[1, slot]).start()

    def wait(slot):
        pltpu.make_async_copy(k_hbm.at[0, :, pl.ds(0, tk), :],
                              kbuf.at[slot], sem.at[0, slot]).wait()
        pltpu.make_async_copy(v_hbm.at[0, :, pl.ds(0, tk), :],
                              vbuf.at[slot], sem.at[1, slot]).wait()

    def scores(kt):
        return jnp.einsum("hqd,hkd->hqk", q, kt,
                          preferred_element_type=jnp.float32)

    # ---- diagonal KV tile first (only tile needing the causal mask; it also
    #      initializes the online-softmax state). ----
    fetch(qi, 0)

    @pl.when(qi > 0)
    def _():
        fetch(0, 1)                                           # prefetch first below-diag tile

    wait(0)
    kt, vt = kbuf[0], vbuf[0]
    s = scores(kt)                                            # (H, tq, tk) f32
    row = lax.broadcasted_iota(jnp.int32, (tq, tk), 0)
    col = lax.broadcasted_iota(jnp.int32, (tq, tk), 1)
    s = jnp.where((row >= col)[None, :, :], s, -1e30)         # keep mask in f32
    m = jnp.max(s, axis=-1, keepdims=True)                    # (H, tq, 1)
    p = jnp.exp(s - m)
    l = jnp.sum(p, axis=-1, keepdims=True)
    acc = jnp.einsum("hqk,hkd->hqd", p.astype(jnp.bfloat16), vt,
                     preferred_element_type=jnp.float32)      # (H, tq, hd)

    # ---- stream the strictly-below-diagonal KV tiles (unmasked). ----
    def body(j, carry):
        m, l, acc = carry
        slot = 1 - (j & 1)                                    # tile 0 -> slot 1, tile 1 -> slot 0, ...
        wait(slot)

        @pl.when(j + 1 < qi)
        def _():
            fetch(j + 1, 1 - slot)                            # other slot already consumed

        kt, vt = kbuf[slot], vbuf[slot]
        s = scores(kt)
        m_new = jnp.maximum(m, jnp.max(s, axis=-1, keepdims=True))
        alpha = jnp.exp(m - m_new)
        p = jnp.exp(s - m_new)
        l = alpha * l + jnp.sum(p, axis=-1, keepdims=True)
        acc = alpha * acc + jnp.einsum("hqk,hkd->hqd", p.astype(jnp.bfloat16),
                                       vt, preferred_element_type=jnp.float32)
        return m_new, l, acc

    m, l, acc = lax.fori_loop(0, qi, body, (m, l, acc))

    attn = acc * pl.reciprocal(l, approx=True)                # (H, tq, hd) f32

    # Output projection: concat heads (lane copies) -> single full-K matmul.
    attn2d = jnp.concatenate([attn[h] for h in range(H)], axis=-1)   # (tq, D)
    proj = jnp.dot(attn2d.astype(jnp.bfloat16), wout_ref[...],
                   preferred_element_type=jnp.float32)        # (tq, D)

    x = x_ref[0].astype(jnp.float32) + proj                   # residual

    # ---- MLP branch (fused; weights resident, single-buffered) ----
    # TODO(synk): for very large D*hidden the MLP weights should be tiled over
    # the hidden axis (or split into their own pallas_call) to bound VMEM.
    ms = jnp.mean(x * x, axis=-1, keepdims=True)
    h2 = x * lax.rsqrt(ms + eps) * gm_ref[...]
    up = jnp.dot(h2.astype(jnp.bfloat16), w1_ref[...],
                 preferred_element_type=jnp.float32)
    # TODO(synk): MLP class body not given in the source; assumed bias-free
    # Linear -> GELU(tanh approx) -> Linear (PyTorch nn.GELU default is erf).
    act = jax.nn.gelu(up, approximate=True)
    down = jnp.dot(act.astype(jnp.bfloat16), w2_ref[...],
                   preferred_element_type=jnp.float32)

    o_ref[0] = (x + down).astype(o_ref.dtype)


# ---------------------------------------------------------------------------
# Host-side preparation (once per model) + wrapper
# ---------------------------------------------------------------------------
def prepare_block_params(params, n_heads, seq_len):
    """Weight transposes/casts and RoPE tables, hoisted out of the forward."""
    D = params["attn_norm"].shape[0]
    hd = D // n_heads
    bf16 = jnp.bfloat16

    inv_freq = 1.0 / (10000.0 ** (jnp.arange(0, hd, 2, dtype=jnp.float32) / hd))
    ang = jnp.arange(seq_len, dtype=jnp.float32)[:, None] * inv_freq[None, :]  # (S, hd/2)
    cos_h = jnp.repeat(jnp.cos(ang), 2, axis=-1)                               # (S, hd)
    sign = jnp.tile(jnp.array([-1.0, 1.0], jnp.float32), hd // 2)
    sin_h = jnp.repeat(jnp.sin(ang), 2, axis=-1) * sign                        # pre-signed

    return {
        "wqkv_t": params["w_qkv"].T.astype(bf16),            # (D, 3D)
        "wout_t": params["w_out"].T.astype(bf16),            # (D, D)
        "w1_t": params["w1"].T.astype(bf16),                 # (D, hidden)
        "w2_t": params["w2"].T.astype(bf16),                 # (hidden, D)
        "ga": params["attn_norm"].reshape(1, D).astype(jnp.float32),
        "gm": params["mlp_norm"].reshape(1, D).astype(jnp.float32),
        "cos": jnp.tile(cos_h, (1, n_heads)),                # (S, D)
        "sin": jnp.tile(sin_h, (1, n_heads)),                # (S, D)
    }


def _vmem_limit_bytes():
    # ~15% headroom below physical per-core VMEM (64 MiB v7x / 128 MiB v5e,v6e).
    try:
        cap = getattr(pltpu.get_tpu_info(), "vmem_capacity_bytes", None)
        if cap:
            return int(min(cap * 0.85, 112 * 1024 * 1024))
    except Exception:
        pass
    return 48 * 1024 * 1024


def _resident_spec(shape):
    """Constant-index operand: single-buffered, fetched once, stays resident."""
    nd = len(shape)
    return pl.BlockSpec(shape, lambda *_: (0,) * nd, pipeline_mode=pl.Buffered(1))


def block_forward(x, prep, n_heads, *, eps=1e-6, block_q=128, block_qkv=None):
    B, S, D = x.shape
    assert D % n_heads == 0
    hd = D // n_heads
    hidden = prep["w1_t"].shape[1]
    bf16 = jnp.bfloat16

    block_q = min(block_q, S)
    block_qkv = min(block_qkv or block_q, S)   # can be raised to 256 on v5e/v6e
    assert S % block_q == 0 and S % block_qkv == 0
    n_s1 = S // block_qkv
    n_q = S // block_q

    vmem_limit = _vmem_limit_bytes()
    cparams = pltpu.CompilerParams(
        dimension_semantics=("parallel", "parallel"),   # batch leading: balanced megacore split
        vmem_limit_bytes=vmem_limit,
    )

    # ---- stage 1: RMSNorm + QKV + RoPE -> head-major bf16 q/k/v ----
    q_scale = 1.0 / math.sqrt(hd)
    s1_cost = pl.CostEstimate(
        flops=2 * B * S * D * 3 * D + 12 * B * S * D,
        transcendentals=B * S,
        bytes_accessed=4 * B * S * D + 8 * S * D + 6 * D * D + 6 * B * S * D,
    )
    qkv_kernel = partial(_qkv_rope_kernel, n_heads=n_heads, head_dim=hd,
                         eps=eps, q_scale=q_scale)
    q, k, v = pl.pallas_call(
        qkv_kernel,
        out_shape=tuple(jax.ShapeDtypeStruct((B, n_heads, S, hd), bf16)
                        for _ in range(3)),
        grid=(B, n_s1),
        in_specs=[
            pl.BlockSpec((1, block_qkv, D), lambda b, s: (b, s, 0)),   # x tile
            pl.BlockSpec((block_qkv, D), lambda b, s: (s, 0)),         # cos (full width)
            pl.BlockSpec((block_qkv, D), lambda b, s: (s, 0)),         # sin (pre-signed)
            _resident_spec((D, 3 * D)),                                # w_qkv^T (bf16)
            _resident_spec((1, D)),                                    # attn_norm gain
        ],
        out_specs=tuple(pl.BlockSpec((1, n_heads, block_qkv, hd),
                                     lambda b, s: (b, 0, s, 0))
                        for _ in range(3)),
        compiler_params=cparams,
        cost_estimate=s1_cost,
    )(x, prep["cos"], prep["sin"], prep["wqkv_t"], prep["ga"])

    # ---- stage 2: streamed-KV causal flash attention + out-proj + residual + MLP ----
    s2_cost = pl.CostEstimate(
        flops=2 * B * n_heads * S * S * hd + 2 * B * S * D * D + 4 * B * S * D * hidden,
        transcendentals=B * n_heads * S * S // 2 + B * S * hidden + B * S,
        bytes_accessed=(8 * B * S * D            # residual in + out (f32)
                        + 2 * B * S * D          # q (bf16)
                        + 2 * B * S * D * (n_q + 1)   # causal K+V re-reads (bf16)
                        + 2 * D * D + 4 * D * hidden),
    )
    attn_kernel = partial(_attn_mlp_kernel, n_heads=n_heads, head_dim=hd,
                          block_q=block_q, block_k=block_q, eps=eps)
    out = pl.pallas_call(
        attn_kernel,
        out_shape=jax.ShapeDtypeStruct((B, S, D), x.dtype),
        grid=(B, n_q),
        in_specs=[
            pl.BlockSpec((1, block_q, D), lambda b, qi: (b, qi, 0)),          # x (residual)
            pl.BlockSpec((1, n_heads, block_q, hd), lambda b, qi: (b, 0, qi, 0)),  # q tile
            pl.BlockSpec(memory_space=pl.ANY),                                # K (HBM, streamed)
            pl.BlockSpec(memory_space=pl.ANY),                                # V (HBM, streamed)
            _resident_spec((D, D)),                                           # w_out^T
            _resident_spec((D, hidden)),                                      # w1^T
            _resident_spec((hidden, D)),                                      # w2^T
            _resident_spec((1, D)),                                           # mlp_norm gain
        ],
        out_specs=pl.BlockSpec((1, block_q, D), lambda b, qi: (b, qi, 0)),
        scratch_shapes=[
            pltpu.VMEM((2, n_heads, block_q, hd), bf16),      # K double buffer
            pltpu.VMEM((2, n_heads, block_q, hd), bf16),      # V double buffer
            pltpu.SemaphoreType.DMA((2, 2)),                  # [K/V, slot]
        ],
        compiler_params=cparams,
        cost_estimate=s2_cost,
    )(x, q, k, v, prep["wout_t"], prep["w1_t"], prep["w2_t"], prep["gm"])
    return out


# ---------------------------------------------------------------------------
# Pure-JAX reference (complex RoPE, dense causal softmax, f32 matmuls)
# ---------------------------------------------------------------------------
def _ref_block(x, params, n_heads, eps=1e-6):
    B, S, D = x.shape
    hd = D // n_heads
    HI = jax.lax.Precision.HIGHEST

    def rms(v, g):
        return v * lax.rsqrt(jnp.mean(v * v, axis=-1, keepdims=True) + eps) * g

    inv_freq = 1.0 / (10000.0 ** (jnp.arange(0, hd, 2, dtype=jnp.float32) / hd))
    ang = jnp.arange(S, dtype=jnp.float32)[:, None] * inv_freq[None, :]
    freqs_cis = jnp.exp(1j * ang.astype(jnp.complex64))                 # (S, hd/2)

    h = rms(x, params["attn_norm"])
    qkv = jnp.matmul(h, params["w_qkv"].T, precision=HI)
    q, k, v = jnp.split(qkv, 3, axis=-1)
    q = q.reshape(B, S, n_heads, hd)
    k = k.reshape(B, S, n_heads, hd)
    v = v.reshape(B, S, n_heads, hd)

    def rope(t):
        tc = t.reshape(B, S, n_heads, hd // 2, 2)
        z = lax.complex(tc[..., 0], tc[..., 1]) * freqs_cis[None, :, None, :]
        return jnp.stack([z.real, z.imag], axis=-1).reshape(B, S, n_heads, hd)

    q, k = rope(q), rope(k)
    q, k, v = (t.transpose(0, 2, 1, 3) for t in (q, k, v))
    scores = jnp.einsum("bhqd,bhkd->bhqk", q, k, precision=HI) / math.sqrt(hd)
    mask = jnp.tril(jnp.ones((S, S), dtype=bool))
    scores = jnp.where(mask, scores, -jnp.inf)
    p = jax.nn.softmax(scores, axis=-1)
    out = jnp.einsum("bhqk,bhkd->bhqd", p, v, precision=HI)
    out = jnp.matmul(out.transpose(0, 2, 1, 3).reshape(B, S, D),
                     params["w_out"].T, precision=HI)
    x = x + out
    h2 = rms(x, params["mlp_norm"])
    up = jax.nn.gelu(jnp.matmul(h2, params["w1"].T, precision=HI), approximate=True)
    mlp = jnp.matmul(up, params["w2"].T, precision=HI)
    return x + mlp


if __name__ == "__main__":
    # cfg: dim=32, n_heads=4 (head_dim=8), expand=2.0 -> hidden=64, seq=24, batch=2
    # seq=24 with block_q=8 exercises three query tiles, so the streamed-KV
    # double buffer actually swaps slots (q tile 2 consumes two prior KV tiles).
    B, S, D, n_heads, expand = 2, 24, 32, 4, 2.0
    H = int(expand * D)

    key = jax.random.PRNGKey(0)
    ks = jax.random.split(key, 5)
    params = {
        "w_qkv": jax.random.normal(ks[0], (3 * D, D), jnp.float32) * (D ** -0.5),
        "w_out": jax.random.normal(ks[1], (D, D), jnp.float32) * (D ** -0.5),
        "w1": jax.random.normal(ks[2], (H, D), jnp.float32) * (D ** -0.5),
        "w2": jax.random.normal(ks[3], (D, H), jnp.float32) * (H ** -0.5),
        "attn_norm": jnp.ones((D,), jnp.float32),
        "mlp_norm": jnp.ones((D,), jnp.float32),
    }
    x = jax.random.normal(ks[4], (B, S, D), jnp.float32)

    prep = prepare_block_params(params, n_heads, S)           # once per model
    out = jax.block_until_ready(block_forward(x, prep, n_heads, block_q=8))
    ref = jax.block_until_ready(_ref_block(x, params, n_heads))

    assert out.shape == (B, S, D)
    # Kernel feeds bf16 operands to the MXU (f32 accumulation); compare against
    # the f32 reference with a bf16-appropriate tolerance.
    np.testing.assert_allclose(np.asarray(out), np.asarray(ref),
                               atol=7.5e-2, rtol=7.5e-2)
    print("KERNEL_OK")
</pallas_src>

<mosaic_0001>
module attributes {stable_mosaic.version = 11 : i64} {
  func.func @_qkv_rope_kernel(%arg0: i32, %arg1: i32, %arg2: memref<1x8x32xf32, #tpu.memory_space<vmem>>, %arg3: memref<8x32xf32, #tpu.memory_space<vmem>>, %arg4: memref<8x32xf32, #tpu.memory_space<vmem>>, %arg5: memref<32x96xbf16, #tpu.memory_space<vmem>>, %arg6: memref<1x32xf32, #tpu.memory_space<vmem>>, %arg7: memref<1x4x8x8xbf16, #tpu.memory_space<vmem>>, %arg8: memref<1x4x8x8xbf16, #tpu.memory_space<vmem>>, %arg9: memref<1x4x8x8xbf16, #tpu.memory_space<vmem>>) attributes {dimension_semantics = [#tpu.dimension_semantics<parallel>, #tpu.dimension_semantics<parallel>], iteration_bounds = array<i64: 2, 3>, scalar_prefetch = 0 : i64, scratch_operands = 0 : i64, tpu.core_type = #tpu.core_type<tc>, window_params = [{transform_indices = @transform_0, window_bounds = array<i64: 1, 8, 32>}, {transform_indices = @transform_1, window_bounds = array<i64: 8, 32>}, {transform_indices = @transform_2, window_bounds = array<i64: 8, 32>}, {pipeline_mode = #tpu.pipeline_mode<synchronous>, transform_indices = @transform_3, window_bounds = array<i64: 32, 96>}, {pipeline_mode = #tpu.pipeline_mode<synchronous>, transform_indices = @transform_4, window_bounds = array<i64: 1, 32>}, {transform_indices = @transform_5, window_bounds = array<i64: 1, 4, 8, 8>}, {transform_indices = @transform_6, window_bounds = array<i64: 1, 4, 8, 8>}, {transform_indices = @transform_7, window_bounds = array<i64: 1, 4, 8, 8>}]} {
    %c0 = arith.constant 0 : index
    %c0_0 = arith.constant 0 : index
    %c0_1 = arith.constant 0 : index
    %0 = vector.load %arg2[%c0, %c0_0, %c0_1] : memref<1x8x32xf32, #tpu.memory_space<vmem>>, vector<1x8x32xf32>
    %1 = vector.shape_cast %0 : vector<1x8x32xf32> to vector<8x32xf32>
    %2 = arith.mulf %1, %1 : vector<8x32xf32>
    %cst = arith.constant dense<0.000000e+00> : vector<8xf32>
    %3 = vector.multi_reduction <add>, %2, %cst [1] : vector<8x32xf32> to vector<8xf32>
    %4 = vector.shape_cast %3 : vector<8xf32> to vector<8x1xf32>
    %cst_2 = arith.constant 3.200000e+01 : f32
    %5 = vector.broadcast %cst_2 : f32 to vector<8x1xf32>
    %6 = arith.divf %4, %5 : vector<8x1xf32>
    %cst_3 = arith.constant 9.99999997E-7 : f32
    %7 = vector.broadcast %cst_3 : f32 to vector<8x1xf32>
    %8 = arith.addf %6, %7 : vector<8x1xf32>
    %9 = math.rsqrt %8 : vector<8x1xf32>
    %10 = vector.broadcast %9 : vector<8x1xf32> to vector<8x32xf32>
    %11 = arith.mulf %1, %10 : vector<8x32xf32>
    %c0_4 = arith.constant 0 : index
    %c0_5 = arith.constant 0 : index
    %12 = vector.load %arg6[%c0_4, %c0_5] : memref<1x32xf32, #tpu.memory_space<vmem>>, vector<1x32xf32>
    %13 = vector.broadcast %12 : vector<1x32xf32> to vector<8x32xf32>
    %14 = arith.mulf %11, %13 : vector<8x32xf32>
    %15 = arith.truncf %14 : vector<8x32xf32> to vector<8x32xbf16>
    %c0_6 = arith.constant 0 : index
    %c0_7 = arith.constant 0 : index
    %16 = vector.load %arg5[%c0_6, %c0_7] : memref<32x96xbf16, #tpu.memory_space<vmem>>, vector<32x96xbf16>
    %cst_8 = arith.constant dense<0.000000e+00> : vector<8x96xf32>
    %17 = tpu.matmul %15, %16, %cst_8 {dimension_numbers = #tpu.dot_dimension_numbers<[1], [0], [0], [1], [0, 0, 1, 1], [], []>} : vector<8x32xbf16>, vector<32x96xbf16>, vector<8x96xf32> -> vector<8x96xf32>
    %18 = vector.extract_strided_slice %17 {offsets = [0, 0], sizes = [8, 32], strides = [1, 1]} : vector<8x96xf32> to vector<8x32xf32>
    %cst_9 = arith.constant 0.353553385 : f32
    %19 = vector.broadcast %cst_9 : f32 to vector<8x32xf32>
    %20 = arith.mulf %18, %19 : vector<8x32xf32>
    %21 = vector.extract_strided_slice %17 {offsets = [0, 32], sizes = [8, 32], strides = [1, 1]} : vector<8x96xf32> to vector<8x32xf32>
    %22 = vector.extract_strided_slice %17 {offsets = [0, 64], sizes = [8, 32], strides = [1, 1]} : vector<8x96xf32> to vector<8x32xf32>
    %c0_10 = arith.constant 0 : index
    %c0_11 = arith.constant 0 : index
    %23 = vector.load %arg3[%c0_10, %c0_11] : memref<8x32xf32, #tpu.memory_space<vmem>>, vector<8x32xf32>
    %c0_12 = arith.constant 0 : index
    %c0_13 = arith.constant 0 : index
    %24 = vector.load %arg4[%c0_12, %c0_13] : memref<8x32xf32, #tpu.memory_space<vmem>>, vector<8x32xf32>
    %25 = tpu.iota {dimensions = array<i32: 1>} : vector<8x32xi32>
    %c2_i32 = arith.constant 2 : i32
    %c0_i32 = arith.constant 0 : i32
    %26 = arith.cmpi eq, %c2_i32, %c0_i32 : i32
    %c1_i32 = arith.constant 1 : i32
    %27 = arith.select %26, %c1_i32, %c2_i32 : i32
    %28 = vector.broadcast %27 : i32 to vector<8x32xi32>
    %29 = arith.remsi %25, %28 : vector<8x32xi32>
    %c0_i32_14 = arith.constant 0 : i32
    %30 = vector.broadcast %c0_i32_14 : i32 to vector<8x32xi32>
    %31 = arith.cmpi ne, %29, %30 : vector<8x32xi32>
    %c0_i32_15 = arith.constant 0 : i32
    %32 = vector.broadcast %c0_i32_15 : i32 to vector<8x32xi32>
    %33 = arith.cmpi slt, %29, %32 : vector<8x32xi32>
    %c0_i32_16 = arith.constant 0 : i32
    %34 = arith.cmpi slt, %27, %c0_i32_16 : i32
    %35 = vector.broadcast %34 : i1 to vector<8x32xi1>
    %36 = vector.broadcast %35 : vector<8x32xi1> to vector<8x32xi1>
    %37 = arith.xori %33, %36 : vector<8x32xi1>
    %38 = arith.andi %37, %31 : vector<8x32xi1>
    %39 = vector.broadcast %27 : i32 to vector<8x32xi32>
    %40 = arith.addi %29, %39 : vector<8x32xi32>
    %41 = arith.select %38, %40, %29 : vector<8x32xi1>, vector<8x32xi32>
    %c0_i32_17 = arith.constant 0 : i32
    %42 = vector.broadcast %c0_i32_17 : i32 to vector<8x32xi32>
    %43 = arith.cmpi eq, %41, %42 : vector<8x32xi32>
    %44 = vector.extract_strided_slice %20 {offsets = [0, 1], sizes = [8, 31], strides = [1, 1]} : vector<8x32xf32> to vector<8x31xf32>
    %45 = vector.extract_strided_slice %20 {offsets = [0, 0], sizes = [8, 1], strides = [1, 1]} : vector<8x32xf32> to vector<8x1xf32>
    %46 = tpu.concatenate %44, %45 in 1 : vector<8x31xf32>, vector<8x1xf32> -> vector<8x32xf32>
    %47 = vector.extract_strided_slice %20 {offsets = [0, 31], sizes = [8, 1], strides = [1, 1]} : vector<8x32xf32> to vector<8x1xf32>
    %48 = vector.extract_strided_slice %20 {offsets = [0, 0], sizes = [8, 31], strides = [1, 1]} : vector<8x32xf32> to vector<8x31xf32>
    %49 = tpu.concatenate %47, %48 in 1 : vector<8x1xf32>, vector<8x31xf32> -> vector<8x32xf32>
    %50 = arith.select %43, %46, %49 : vector<8x32xi1>, vector<8x32xf32>
    %51 = arith.mulf %20, %23 : vector<8x32xf32>
    %52 = arith.mulf %50, %24 : vector<8x32xf32>
    %53 = arith.addf %51, %52 : vector<8x32xf32>
    %54 = vector.extract_strided_slice %21 {offsets = [0, 1], sizes = [8, 31], strides = [1, 1]} : vector<8x32xf32> to vector<8x31xf32>
    %55 = vector.extract_strided_slice %21 {offsets = [0, 0], sizes = [8, 1], strides = [1, 1]} : vector<8x32xf32> to vector<8x1xf32>
    %56 = tpu.concatenate %54, %55 in 1 : vector<8x31xf32>, vector<8x1xf32> -> vector<8x32xf32>
    %57 = vector.extract_strided_slice %21 {offsets = [0, 31], sizes = [8, 1], strides = [1, 1]} : vector<8x32xf32> to vector<8x1xf32>
    %58 = vector.extract_strided_slice %21 {offsets = [0, 0], sizes = [8, 31], strides = [1, 1]} : vector<8x32xf32> to vector<8x31xf32>
    %59 = tpu.concatenate %57, %58 in 1 : vector<8x1xf32>, vector<8x31xf32> -> vector<8x32xf32>
    %60 = arith.select %43, %56, %59 : vector<8x32xi1>, vector<8x32xf32>
    %61 = arith.mulf %21, %23 : vector<8x32xf32>
    %62 = arith.mulf %60, %24 : vector<8x32xf32>
    %63 = arith.addf %61, %62 : vector<8x32xf32>
    %64 = vector.extract_strided_slice %53 {offsets = [0, 0], sizes = [8, 8], strides = [1, 1]} : vector<8x32xf32> to vector<8x8xf32>
    %65 = arith.truncf %64 : vector<8x8xf32> to vector<8x8xbf16>
    %c0_18 = arith.constant 0 : index
    %c0_19 = arith.constant 0 : index
    %c0_20 = arith.constant 0 : index
    %c0_21 = arith.constant 0 : index
    %66 = vector.load %arg7[%c0_18, %c0_19, %c0_20, %c0_21] : memref<1x4x8x8xbf16, #tpu.memory_space<vmem>>, vector<1x1x8x8xbf16>
    %67 = vector.shape_cast %66 : vector<1x1x8x8xbf16> to vector<8x8xbf16>
    %68 = vector.shape_cast %65 : vector<8x8xbf16> to vector<1x1x8x8xbf16>
    tpu.vector_store %arg7[%c0_18, %c0_19, %c0_20, %c0_21], %68 {strides = array<i32>} : memref<1x4x8x8xbf16, #tpu.memory_space<vmem>>, vector<1x1x8x8xbf16>,
    %69 = vector.extract_strided_slice %63 {offsets = [0, 0], sizes = [8, 8], strides = [1, 1]} : vector<8x32xf32> to vector<8x8xf32>
    %70 = arith.truncf %69 : vector<8x8xf32> to vector<8x8xbf16>
    %c0_22 = arith.constant 0 : index
    %c0_23 = arith.constant 0 : index
    %c0_24 = arith.constant 0 : index
    %c0_25 = arith.constant 0 : index
    %71 = vector.load %arg8[%c0_22, %c0_23, %c0_24, %c0_25] : memref<1x4x8x8xbf16, #tpu.memory_space<vmem>>, vector<1x1x8x8xbf16>
    %72 = vector.shape_cast %71 : vector<1x1x8x8xbf16> to vector<8x8xbf16>
    %73 = vector.shape_cast %70 : vector<8x8xbf16> to vector<1x1x8x8xbf16>
    tpu.vector_store %arg8[%c0_22, %c0_23, %c0_24, %c0_25], %73 {strides = array<i32>} : memref<1x4x8x8xbf16, #tpu.memory_space<vmem>>, vector<1x1x8x8xbf16>,
    %74 = vector.extract_strided_slice %22 {offsets = [0, 0], sizes = [8, 8], strides = [1, 1]} : vector<8x32xf32> to vector<8x8xf32>
    %75 = arith.truncf %74 : vector<8x8xf32> to vector<8x8xbf16>
    %c0_26 = arith.constant 0 : index
    %c0_27 = arith.constant 0 : index
    %c0_28 = arith.constant 0 : index
    %c0_29 = arith.constant 0 : index
    %76 = vector.load %arg9[%c0_26, %c0_27, %c0_28, %c0_29] : memref<1x4x8x8xbf16, #tpu.memory_space<vmem>>, vector<1x1x8x8xbf16>
    %77 = vector.shape_cast %76 : vector<1x1x8x8xbf16> to vector<8x8xbf16>
    %78 = vector.shape_cast %75 : vector<8x8xbf16> to vector<1x1x8x8xbf16>
    tpu.vector_store %arg9[%c0_26, %c0_27, %c0_28, %c0_29], %78 {strides = array<i32>} : memref<1x4x8x8xbf16, #tpu.memory_space<vmem>>, vector<1x1x8x8xbf16>,
    %79 = vector.extract_strided_slice %53 {offsets = [0, 8], sizes = [8, 8], strides = [1, 1]} : vector<8x32xf32> to vector<8x8xf32>
    %80 = arith.truncf %79 : vector<8x8xf32> to vector<8x8xbf16>
    %c0_30 = arith.constant 0 : index
    %c1 = arith.constant 1 : index
    %c0_31 = arith.constant 0 : index
    %c0_32 = arith.constant 0 : index
    %81 = vector.load %arg7[%c0_30, %c1, %c0_31, %c0_32] : memref<1x4x8x8xbf16, #tpu.memory_space<vmem>>, vector<1x1x8x8xbf16>
    %82 = vector.shape_cast %81 : vector<1x1x8x8xbf16> to vector<8x8xbf16>
    %83 = vector.shape_cast %80 : vector<8x8xbf16> to vector<1x1x8x8xbf16>
    tpu.vector_store %arg7[%c0_30, %c1, %c0_31, %c0_32], %83 {strides = array<i32>} : memref<1x4x8x8xbf16, #tpu.memory_space<vmem>>, vector<1x1x8x8xbf16>,
    %84 = vector.extract_strided_slice %63 {offsets = [0, 8], sizes = [8, 8], strides = [1, 1]} : vector<8x32xf32> to vector<8x8xf32>
    %85 = arith.truncf %84 : vector<8x8xf32> to vector<8x8xbf16>
    %c0_33 = arith.constant 0 : index
    %c1_34 = arith.constant 1 : index
    %c0_35 = arith.constant 0 : index
    %c0_36 = arith.constant 0 : index
    %86 = vector.load %arg8[%c0_33, %c1_34, %c0_35, %c0_36] : memref<1x4x8x8xbf16, #tpu.memory_space<vmem>>, vector<1x1x8x8xbf16>
    %87 = vector.shape_cast %86 : vector<1x1x8x8xbf16> to vector<8x8xbf16>
    %88 = vector.shape_cast %85 : vector<8x8xbf16> to vector<1x1x8x8xbf16>
    tpu.vector_store %arg8[%c0_33, %c1_34, %c0_35, %c0_36], %88 {strides = array<i32>} : memref<1x4x8x8xbf16, #tpu.memory_space<vmem>>, vector<1x1x8x8xbf16>,
    %89 = vector.extract_strided_slice %22 {offsets = [0, 8], sizes = [8, 8], strides = [1, 1]} : vector<8x32xf32> to vector<8x8xf32>
    %90 = arith.truncf %89 : vector<8x8xf32> to vector<8x8xbf16>
    %c0_37 = arith.constant 0 : index
    %c1_38 = arith.constant 1 : index
    %c0_39 = arith.constant 0 : index
    %c0_40 = arith.constant 0 : index
    %91 = vector.load %arg9[%c0_37, %c1_38, %c0_39, %c0_40] : memref<1x4x8x8xbf16, #tpu.memory_space<vmem>>, vector<1x1x8x8xbf16>
    %92 = vector.shape_cast %91 : vector<1x1x8x8xbf16> to vector<8x8xbf16>
    %93 = vector.shape_cast %90 : vector<8x8xbf16> to vector<1x1x8x8xbf16>
    tpu.vector_store %arg9[%c0_37, %c1_38, %c0_39, %c0_40], %93 {strides = array<i32>} : memref<1x4x8x8xbf16, #tpu.memory_space<vmem>>, vector<1x1x8x8xbf16>,
    %94 = vector.extract_strided_slice %53 {offsets = [0, 16], sizes = [8, 8], strides = [1, 1]} : vector<8x32xf32> to vector<8x8xf32>
    %95 = arith.truncf %94 : vector<8x8xf32> to vector<8x8xbf16>
    %c0_41 = arith.constant 0 : index
    %c2 = arith.constant 2 : index
    %c0_42 = arith.constant 0 : index
    %c0_43 = arith.constant 0 : index
    %96 = vector.load %arg7[%c0_41, %c2, %c0_42, %c0_43] : memref<1x4x8x8xbf16, #tpu.memory_space<vmem>>, vector<1x1x8x8xbf16>
    %97 = vector.shape_cast %96 : vector<1x1x8x8xbf16> to vector<8x8xbf16>
    %98 = vector.shape_cast %95 : vector<8x8xbf16> to vector<1x1x8x8xbf16>
    tpu.vector_store %arg7[%c0_41, %c2, %c0_42, %c0_43], %98 {strides = array<i32>} : memref<1x4x8x8xbf16, #tpu.memory_space<vmem>>, vector<1x1x8x8xbf16>,
    %99 = vector.extract_strided_slice %63 {offsets = [0, 16], sizes = [8, 8], strides = [1, 1]} : vector<8x32xf32> to vector<8x8xf32>
    %100 = arith.truncf %99 : vector<8x8xf32> to vector<8x8xbf16>
    %c0_44 = arith.constant 0 : index
    %c2_45 = arith.constant 2 : index
    %c0_46 = arith.constant 0 : index
    %c0_47 = arith.constant 0 : index
    %101 = vector.load %arg8[%c0_44, %c2_45, %c0_46, %c0_47] : memref<1x4x8x8xbf16, #tpu.memory_space<vmem>>, vector<1x1x8x8xbf16>
    %102 = vector.shape_cast %101 : vector<1x1x8x8xbf16> to vector<8x8xbf16>
    %103 = vector.shape_cast %100 : vector<8x8xbf16> to vector<1x1x8x8xbf16>
    tpu.vector_store %arg8[%c0_44, %c2_45, %c0_46, %c0_47], %103 {strides = array<i32>} : memref<1x4x8x8xbf16, #tpu.memory_space<vmem>>, vector<1x1x8x8xbf16>,
    %104 = vector.extract_strided_slice %22 {offsets = [0, 16], sizes = [8, 8], strides = [1, 1]} : vector<8x32xf32> to vector<8x8xf32>
    %105 = arith.truncf %104 : vector<8x8xf32> to vector<8x8xbf16>
    %c0_48 = arith.constant 0 : index
    %c2_49 = arith.constant 2 : index
    %c0_50 = arith.constant 0 : index
    %c0_51 = arith.constant 0 : index
    %106 = vector.load %arg9[%c0_48, %c2_49, %c0_50, %c0_51] : memref<1x4x8x8xbf16, #tpu.memory_space<vmem>>, vector<1x1x8x8xbf16>
    %107 = vector.shape_cast %106 : vector<1x1x8x8xbf16> to vector<8x8xbf16>
    %108 = vector.shape_cast %105 : vector<8x8xbf16> to vector<1x1x8x8xbf16>
    tpu.vector_store %arg9[%c0_48, %c2_49, %c0_50, %c0_51], %108 {strides = array<i32>} : memref<1x4x8x8xbf16, #tpu.memory_space<vmem>>, vector<1x1x8x8xbf16>,
    %109 = vector.extract_strided_slice %53 {offsets = [0, 24], sizes = [8, 8], strides = [1, 1]} : vector<8x32xf32> to vector<8x8xf32>
    %110 = arith.truncf %109 : vector<8x8xf32> to vector<8x8xbf16>
    %c0_52 = arith.constant 0 : index
    %c3 = arith.constant 3 : index
    %c0_53 = arith.constant 0 : index
    %c0_54 = arith.constant 0 : index
    %111 = vector.load %arg7[%c0_52, %c3, %c0_53, %c0_54] : memref<1x4x8x8xbf16, #tpu.memory_space<vmem>>, vector<1x1x8x8xbf16>
    %112 = vector.shape_cast %111 : vector<1x1x8x8xbf16> to vector<8x8xbf16>
    %113 = vector.shape_cast %110 : vector<8x8xbf16> to vector<1x1x8x8xbf16>
    tpu.vector_store %arg7[%c0_52, %c3, %c0_53, %c0_54], %113 {strides = array<i32>} : memref<1x4x8x8xbf16, #tpu.memory_space<vmem>>, vector<1x1x8x8xbf16>,
    %114 = vector.extract_strided_slice %63 {offsets = [0, 24], sizes = [8, 8], strides = [1, 1]} : vector<8x32xf32> to vector<8x8xf32>
    %115 = arith.truncf %114 : vector<8x8xf32> to vector<8x8xbf16>
    %c0_55 = arith.constant 0 : index
    %c3_56 = arith.constant 3 : index
    %c0_57 = arith.constant 0 : index
    %c0_58 = arith.constant 0 : index
    %116 = vector.load %arg8[%c0_55, %c3_56, %c0_57, %c0_58] : memref<1x4x8x8xbf16, #tpu.memory_space<vmem>>, vector<1x1x8x8xbf16>
    %117 = vector.shape_cast %116 : vector<1x1x8x8xbf16> to vector<8x8xbf16>
    %118 = vector.shape_cast %115 : vector<8x8xbf16> to vector<1x1x8x8xbf16>
    tpu.vector_store %arg8[%c0_55, %c3_56, %c0_57, %c0_58], %118 {strides = array<i32>} : memref<1x4x8x8xbf16, #tpu.memory_space<vmem>>, vector<1x1x8x8xbf16>,
    %119 = vector.extract_strided_slice %22 {offsets = [0, 24], sizes = [8, 8], strides = [1, 1]} : vector<8x32xf32> to vector<8x8xf32>
    %120 = arith.truncf %119 : vector<8x8xf32> to vector<8x8xbf16>
    %c0_59 = arith.constant 0 : index
    %c3_60 = arith.constant 3 : index
    %c0_61 = arith.constant 0 : index
    %c0_62 = arith.constant 0 : index
    %121 = vector.load %arg9[%c0_59, %c3_60, %c0_61, %c0_62] : memref<1x4x8x8xbf16, #tpu.memory_space<vmem>>, vector<1x1x8x8xbf16>
    %122 = vector.shape_cast %121 : vector<1x1x8x8xbf16> to vector<8x8xbf16>
    %123 = vector.shape_cast %120 : vector<8x8xbf16> to vector<1x1x8x8xbf16>
    tpu.vector_store %arg9[%c0_59, %c3_60, %c0_61, %c0_62], %123 {strides = array<i32>} : memref<1x4x8x8xbf16, #tpu.memory_space<vmem>>, vector<1x1x8x8xbf16>,
    return
  }
  func.func @transform_0(%arg0: i32, %arg1: i32) -> (i32, i32, i32) {
    %c0_i32 = arith.constant 0 : i32
    %c0_i32_0 = arith.constant 0 : i32
    return %arg0, %arg1, %c0_i32 : i32, i32, i32
  }
  func.func @transform_1(%arg0: i32, %arg1: i32) -> (i32, i32) {
    %c0_i32 = arith.constant 0 : i32
    %c0_i32_0 = arith.constant 0 : i32
    return %arg1, %c0_i32 : i32, i32
  }
  func.func @transform_2(%arg0: i32, %arg1: i32) -> (i32, i32) {
    %c0_i32 = arith.constant 0 : i32
    %c0_i32_0 = arith.constant 0 : i32
    return %arg1, %c0_i32 : i32, i32
  }
  func.func @transform_3(%arg0: i32, %arg1: i32) -> (i32, i32) {
    %c0_i32 = arith.constant 0 : i32
    %c0_i32_0 = arith.constant 0 : i32
    %c0_i32_1 = arith.constant 0 : i32
    return %c0_i32, %c0_i32_0 : i32, i32
  }
  func.func @transform_4(%arg0: i32, %arg1: i32) -> (i32, i32) {
    %c0_i32 = arith.constant 0 : i32
    %c0_i32_0 = arith.constant 0 : i32
    %c0_i32_1 = arith.constant 0 : i32
    return %c0_i32, %c0_i32_0 : i32, i32
  }
  func.func @transform_5(%arg0: i32, %arg1: i32) -> (i32, i32, i32, i32) {
    %c0_i32 = arith.constant 0 : i32
    %c0_i32_0 = arith.constant 0 : i32
    %c0_i32_1 = arith.constant 0 : i32
    return %arg0, %c0_i32, %arg1, %c0_i32_0 : i32, i32, i32, i32
  }
  func.func @transform_6(%arg0: i32, %arg1: i32) -> (i32, i32, i32, i32) {
    %c0_i32 = arith.constant 0 : i32
    %c0_i32_0 = arith.constant 0 : i32
    %c0_i32_1 = arith.constant 0 : i32
    return %arg0, %c0_i32, %arg1, %c0_i32_0 : i32, i32, i32, i32
  }
  func.func @transform_7(%arg0: i32, %arg1: i32) -> (i32, i32, i32, i32) {
    %c0_i32 = arith.constant 0 : i32
    %c0_i32_0 = arith.constant 0 : i32
    %c0_i32_1 = arith.constant 0 : i32
    return %arg0, %c0_i32, %arg1, %c0_i32_0 : i32, i32, i32, i32
  }
}

</mosaic_0001>

<bundles_post_ra>
// kernel: tpu_custom_call.1
= control target key start
LH: loop header
LB: loop body
LE: loop exit
PB: predicated region body
PF: predicated region fallthrough
CT: control target
= control target key end

     0   :  { %s1848_s0 = inlined_call_operand.hbm [shape: f32[2,24,32], index: 0, kind: input, shape index: {}]   ;;  %s1849_s1 = inlined_call_operand.hbm [shape: f32[24,32], index: 1, kind: input, shape index: {}]   ;;  %s1850_s2 = inlined_call_operand.hbm [shape: f32[24,32], index: 2, kind: input, shape index: {}]   ;;  %s1851_s3 = inlined_call_operand.hbm [shape: bf16[32,96], index: 3, kind: input, shape index: {}]   ;;  %s1852_s4 = inlined_call_operand.vmem [shape: f32[1,32], index: 4, kind: input, shape index: {}]   ;;  %s1853_s5 = inlined_call_operand.vmem [shape: bf16[2,4,24,8], index: 5, kind: output, shape index: {0}]   ;;  %s1854_s6 = inlined_call_operand.vmem [shape: bf16[2,4,24,8], index: 6, kind: output, shape index: {1}]   ;;  %s1855_s7 = inlined_call_operand.vmem [shape: bf16[2,4,24,8], index: 7, kind: output, shape index: {2}]  }
   0x1   :  { %1870 = sst [smem:[#allocation23_spill]] %s1849_s1 }
   0x2   :  { %1871 = sst [smem:[#allocation24_spill]] %s1851_s3 }
   0x3   :  { %1872 = sst [smem:[#allocation25_spill]] %s1852_s4 }
   0x4   :  { %1873 = sst [smem:[#allocation26_spill]] %s1853_s5 }
   0x5   :  { %1874 = sst [smem:[#allocation27_spill]] %s1854_s6 }
   0x6   :  { %1875 = sst [smem:[#allocation28_spill]] %s1855_s7 }
   0x7   :  { %13 = vsyncpa [#allocation3], 0 }
   0x8   :  { %15 = vsyncpa [#allocation3 + $0x1], 0 }
   0x9   :  { %16 = vsyncpa [#allocation5], 0 }
   0xa   :  { %18 = vsyncpa [#allocation5 + $0x1], 0 }
   0xb   :  { %19 = vsyncpa [#allocation8], 0  ;;  %s1485_s24 = smov 0   ;;  %s1487_s25 = smov 0  }
   0xc   :  { %s1489_s26 = smov 0   ;;  %s1491_s27 = smov 0  }
   0xd   :  { %s1493_s28 = smov 0   ;;  %s1495_s29 = smov 0  }
   0xe   :  { %s1497_s30 = smov 0   ;;  %s1499_s8 = smov 0  }
   0xf   :  { %s1501_s9 = smov 0   ;;  %s1503_s10 = smov 0  }
  0x10   :  { %s1505_s11 = smov 0  }
  0x11 LB: > { %1876 = sst [smem:[#allocation15_spill]] %s1381_s25  ;;  %s34_s12 = sadd.s32 1, %s1409_s9  ;;  %s1417_s11 = sphi %s1505_s11, %s25_s11   ;;  %s1413_s10 = sphi %s1503_s10, %s1927_s10   ;;  %s1409_s9 = sphi %s1501_s9, %s1926_s9   ;;  %s1405_s8 = sphi %s1499_s8, %s1925_s8   ;;  %s1401_s30 = sphi %s1497_s30, %s1924_s30   ;;  %s1397_s29 = sphi %s1495_s29, %s1923_s29   ;;  %s1393_s28 = sphi %s1493_s28, %s1922_s28   ;;  %s1389_s27 = sphi %s1491_s27, %s1921_s27   ;;  %s1385_s26 = sphi %s1489_s26, %s1918_s26   ;;  %s1381_s25 = sphi %s1487_s25, %s1917_s25   ;;  %s1377_s24 = sphi %s1485_s24, %s1916_s24  }
  0x12   : > { %1877 = sst [smem:[#allocation16_spill]] %s1385_s26  ;;  %p1859_p0 = scmp.eq.s32.totalorder %s1417_s11, 0 }
  0x13   : > { %1878 = sst [smem:[#allocation17_spill]] %s1401_s30  ;;  %p1542_p1 = scmp.ge.s32.totalorder %s34_s12, 3 }
  0x14   : > { %1879 = sst [smem:[#allocation18_spill]] %s1405_s8  ;;  %s72_s14 = sadd.s32 1, %s1385_s26 }
  0x15   : > { %p79_p2 = scmp.ne.s32.totalorder %s1385_s26, %s1381_s25  ;;  %s1929_s12 = smov (%p1542_p1, %s34_s12), 0 }
  0x16   : > { %1881 = sst [smem:[#allocation19_spill]] %s1929_s12  ;;  %s1557_s15 = ssub.s32 %s1409_s9, %s1929_s12 }
  0x17   : > { %p81_p3 = por %p79_p2, %p1859_p0  ;;  %p1858_p4 = scmp.lt.s32.totalorder %s1417_s11, 6 }
  0x18   : > { %p70_p5 = scmp.eq.s32.totalorder %s1557_s15, 0  ;;  %s297_s16 = sand.u32 1, %s1417_s11  }
  0x19   : > { %s299_s17 = sand.u32 1, %s1385_s26   ;;  %s1863_s20 = sshll.u32 %s1409_s9, 7 }
  0x1a   : > { %s1564_s18 = scalar_select %p70_p5, %s1385_s26, %s72_s14  }
  0x1b   : > { %s1566_s19 = sshll.u32 %s299_s17, 3  ;;  %s1883_s1 = sld [smem:[#allocation23_spill]] }
  0x1c   : > { %1882 = sst [smem:[#allocation20_spill]] %s1564_s18  ;;  %s301_s7 = scalar_lea.vmem [#allocation4], %s1566_s19 }
  0x1d   : > { %s308_s6 = sshll.u32 %s301_s7, 4  ;;  %p1577_p6 = pnand %p1858_p4, %p81_p3  ;;  %s309_s6 = int_to_ptr.vmem [resolvable:$true] %s308_s6 }
  0x1e   : > { %p85_p7 = scmp.ne.s32.totalorder %s1381_s25, %s1377_s24  ;;  %s1583_s14 = scalar_lea.sflag [#allocation5], %s297_s16 }
  0x1f   : > { %s1884_s12 = scalar_select %p1577_p6, 1, 0 }
  0x20   : > { %p1857_p8 = pneg %p1577_p6  ;;  %s1222_s17 = scalar_lea.vmem %s309_s6, 128 }
  0x21   : > { %s306_s23 = scalar_lea.hbm %s1883_s1, %s1863_s20  ;;  %p1223_p9 = scmp.ne.s32.totalorder %s309_s6, %s1222_s17 }
  0x22   : > { %s1419_s7 = smov [#allocation4]  }
  0x23   : > { %p1225_p10 = pnand %p1223_p9, %p1857_p8  ;;  %s1227_s21 = sshll.u32 %s1419_s7, 4  ;;  %s1228_s21 = int_to_ptr.vmem [resolvable:$false] %s1227_s21 }
  0x24   : > { %s1229_s22 = scalar_lea.vmem %s1228_s21, 256  ;;  %p1230_p12 = scmp.lt.s32.totalorder %s309_s6, %s1228_s21 }
  0x25   : > { %p1226_p11 = pneg %p1225_p10  ;;  %p1231_p13 = scmp.lt.s32.totalorder %s1229_s22, %s1222_s17 }
  0x27   : > { %p1232_p2 = por %p1231_p13, %p1230_p12 }
  0x29   : > { %p1233_p3 = pnand %p1232_p2, %p1226_p11 }
  0x2b   : > { %1236 = shalt.err (!%p1233_p3)
}
  0x2c   : > { %1087 = dma.hbm_to_vmem [thread:$0]  (!%p1577_p6), %s306_s23, 128, %s309_s6, %s1583_s14  }
  0x2d   : > { %s1594_s16 = sadd.s32 4294967295, %s1417_s11   ;;  %p1008_p5 = scmp.ge.s32.totalorder %s1417_s11, 1 }
  0x2e   : > { %p1869_p9 = scmp.eq.s32.totalorder %s1594_s16, 0  ;;  %p248_p10 = scmp.lt.s32.totalorder %s1417_s11, 7 }
  0x2f   : > { %s1420_s6 = smov [#allocation7]  }
  0x30   : > { %p1604_p11 = por %p85_p7, %p1869_p9  ;;  %p1608_p12 = pnand %p1008_p5, %p248_p10 }
  0x31   : > { %s260_s23 = sshll.u32 %s1420_s6, 4  ;;  %s261_s23 = int_to_ptr.vmem [resolvable:$true] %s260_s23 }
  0x32   : > { %s1885_s17 = scalar_select %p1604_p11, 1, 0 }
  0x33   : > { %p1077_p13 = pneg %p1608_p12  ;;  %s1248_s21 = scalar_lea.vmem %s261_s23, 256 }
  0x34   : > { %1886 = sst [smem:[#allocation21_spill]] %s1885_s17  ;;  %p1249_p8 = scmp.ne.s32.totalorder %s261_s23, %s1248_s21 }
  0x35   : > { %p1078_p2 = pnand %p1077_p13, %p1869_p9  ;;  %p1256_p0 = scmp.lt.s32.totalorder %s261_s23, %s261_s23 }
  0x36   : > { %p1257_p6 = scmp.lt.s32.totalorder %s1248_s21, %s1248_s21 }
  0x37   : > { %p1239_p3 = pneg %p1078_p2 }
  0x38   : > { %p1258_p11 = por %p1257_p6, %p1256_p0 }
  0x39   : > { %p1251_p4 = pnand %p1249_p8, %p1239_p3 }
  0x3b   : > { %p1252_p7 = pneg %p1251_p4 }
  0x3d   : > { %p1259_p5 = pnand %p1258_p11, %p1252_p7 }
  0x3f   : > { %1262 = shalt.err (!%p1259_p5)
}
  0x40   : > { %s1421_s24 = smov 64   ;;  %s1422_s22 = smov 4  }
  0x41   : > { %s1888_s3 = sld [smem:[#allocation24_spill]]  ;;  %s37_s20 = sadd.s32 1, %s1413_s10 }
  0x42   : > { %s1931_s20 = smov (!%p1542_p1, %s37_s20), %s1413_s10  ;;  %s46_s1 = sadd.s32 1, %s1397_s29 }
  0x43   : > { %p53_p0 = scmp.ne.s32.totalorder %s1397_s29, %s1393_s28  ;;  %p39_p4 = scmp.ge.s32.totalorder %s1931_s20, 2 }
  0x44   : > { %p59_p6 = scmp.ne.s32.totalorder %s1393_s28, %s1389_s27  ;;  %p1889_p8 = scmp.eq.s32.totalorder %s1417_s11, 0 }
  0x45   : > { %p179_p11 = scmp.eq.s32.totalorder %s1594_s16, 5  ;;  %s1933_s20 = smov (%p39_p4, %s1931_s20), 0 }
  0x46   : > { %p1630_p10 = por %p1889_p8, %p53_p0  ;;  %1891 = sst [smem:[#allocation22_spill]] %s1933_s20 }
  0x47   : > { %1080 = dma.hbm_to_vmem [thread:$0]  (!%p1078_p2), %s1888_s3, 256, %s261_s23, [#allocation8], %s1421_s24, %s1421_s24, %s1422_s22  }
  0x48   : > { %p1639_p13 = por %p1869_p9, %p59_p6  ;;  %p1643_p1 = por %p179_p11, %p53_p0 }
  0x49   : > { %s41_s27 = ssub.s32 %s1413_s10, %s1933_s20  ;;  %s277_s24 = sand.u32 1, %s1397_s29  }
  0x4a   : > { %s43_s22 = sor.u32 %s1557_s15, %s41_s27  ;;  %s1011_s6 = sshll.u32 %s277_s24, 3 }
  0x4b   : > { %p44_p2 = scmp.eq.s32.totalorder %s43_s22, 0  ;;  %s1063_s21 = smul.u32 3, %s1413_s10 }
  0x4c   : > { %s281_s5 = scalar_lea.vmem [#allocation2], %s1011_s6  ;;  %p1894_p3 = scmp.lt.s32.totalorder %s1417_s11, 6 }
  0x4d   : > { %s1653_s3 = scalar_select %p44_p2, %s1397_s29, %s46_s1  }
  0x4e   : > { %s286_s26 = sadd.s32 %s1409_s9, %s1063_s21  ;;  %s290_s30 = sshll.u32 %s281_s5, 4  ;;  %s291_s30 = int_to_ptr.vmem [resolvable:$true] %s290_s30 }
  0x4f   : > { %s1012_s8 = sshll.u32 %s286_s26, 7  ;;  %p1663_p7 = pnand %p1894_p3, %p1630_p10 }
  0x50   : > { %s288_s25 = scalar_lea.hbm %s1848_s0, %s1012_s8  ;;  %s1896_s15 = sshll.u32 %s1409_s9, 7 }
  0x51   : > { %s1672_s1 = scalar_lea.hbm %s1850_s2, %s1896_s15  ;;  %s319_s5 = scalar_lea.vmem [#allocation6], %s1566_s19 }
  0x52   : > { %s326_s26 = sshll.u32 %s319_s5, 4  ;;  %s278_s6 = scalar_lea.sflag [#allocation3], %s277_s24  ;;  %s1675_s26 = int_to_ptr.vmem [resolvable:$true] %s326_s26 }
  0x53   : > { %p1265_p5 = pneg %p1663_p7  ;;  %s1276_s4 = scalar_lea.vmem %s291_s30, 128 }
  0x54   : > { %p1277_p0 = scmp.ne.s32.totalorder %s291_s30, %s1276_s4  ;;  %s1423_s8 = smov [#allocation2]  }
  0x55   : > { %s1281_s18 = sshll.u32 %s1423_s8, 4  ;;  %s1282_s18 = int_to_ptr.vmem [resolvable:$false] %s1281_s18 }
  0x56   : > { %p1279_p4 = pnand %p1277_p0, %p1265_p5  ;;  %s1283_s17 = scalar_lea.vmem %s1282_s18, 256 }
  0x57   : > { %p1284_p8 = scmp.lt.s32.totalorder %s291_s30, %s1282_s18  ;;  %p1285_p10 = scmp.lt.s32.totalorder %s1283_s17, %s1276_s4 }
  0x58   : > { %p1280_p6 = pneg %p1279_p4 }
  0x59   : > { %p1286_p11 = por %p1285_p10, %p1284_p8 }
  0x5b   : > { %p1287_p2 = pnand %p1286_p11, %p1280_p6 }
  0x5d   : > { %1290 = shalt.err (!%p1287_p2)
}
  0x5e   : > { %1084 = dma.hbm_to_vmem [thread:$0]  (!%p1663_p7), %s288_s25, 128, %s291_s30, %s278_s6  }
  0x5f   : > { %s1304_s19 = scalar_lea.vmem %s1675_s26, 128  ;;  %p1897_p5 = scmp.ne.s32.totalorder %s1884_s12, 0 }
  0x60   : > { %p1305_p3 = scmp.ne.s32.totalorder %s1675_s26, %s1304_s19  ;;  %s1424_s24 = smov [#allocation6]  }
  0x61   : > { %p1898_p0 = pneg %p1897_p5  ;;  %s1309_s21 = sshll.u32 %s1424_s24, 4  ;;  %s1310_s21 = int_to_ptr.vmem [resolvable:$false] %s1309_s21 }
  0x62   : > { %s1311_s15 = scalar_lea.vmem %s1310_s21, 256  ;;  %p1312_p8 = scmp.lt.s32.totalorder %s1675_s26, %s1310_s21 }
  0x63   : > { %p1307_p4 = pnand %p1305_p3, %p1898_p0  ;;  %p1313_p6 = scmp.lt.s32.totalorder %s1311_s15, %s1304_s19 }
  0x65   : > { %p1308_p9 = pneg %p1307_p4  ;;  %p1314_p10 = por %p1313_p6, %p1312_p8 }
  0x67   : > { %p1315_p11 = pnand %p1314_p10, %p1308_p9 }
  0x69   : > { %1318 = shalt.err (!%p1315_p11)
}
  0x6a   : > { %1090 = dma.hbm_to_vmem [thread:$0]  (!%p1897_p5), %s1672_s1, 128, %s1675_s26, %s1583_s14  }
  0x6b   : > { %335 = sbr.rel (%p1608_p12) target bundleno = 881 (0x371), region = 40  ;;  %s1695_s25 = sand.u32 (!%p1608_p12), 1, %s1393_s28  }
  0x6c   : > { %s1018_s30 = sshll.u32 (!%p1608_p12), %s1695_s25, 3  ;;  %s338_s20 = scalar_lea.sflag (!%p1608_p12), [#allocation3], %s1695_s25 }
  0x6d   : > { %s341_s27 = scalar_lea.vmem (!%p1608_p12), [#allocation2], %s1018_s30 }
  0x70   : > { %1364 = dma.done.wait (%p1639_p13), %s338_s20, 128  }
  0x71   : > { %1366 = vsyncadd (%p1639_p13), %s338_s20, 4294967168  ;;  %s1899_s12 = sld [smem:[#allocation15_spill]]  ;;  %s346_s22 = sand.u32 1, %s1594_s16  }
  0x72   : > { %s1900_s14 = sld [smem:[#allocation21_spill]]  ;;  %s347_s5 = scalar_lea.sflag [#allocation5], %s346_s22 }
  0x77   : > { %s348_s7 = sand.u32 1, %s1899_s12  }
  0x78   : > { %s1705_s1 = sshll.u32 %s348_s7, 3  ;;  %p1901_p9 = scmp.ne.s32.totalorder %s1900_s14, 0 }
  0x79   : > { %s350_s26 = scalar_lea.vmem [#allocation4], %s1705_s1 }
  0x7a   : > { %1368 = dma.done.wait (%p1901_p9), %s347_s5, 256  }
  0x7b   : > { %1370 = vsyncadd (%p1901_p9), %s347_s5, 4294967040  ;;  %s359_s6 = scalar_lea.vmem [#allocation6], %s1705_s1  ;;  %p1902_p12 = scmp.eq.s32.totalorder %s1594_s16, 0 }
  0x7d   : > { %1372 = dma.done.wait (%p1902_p12), [#allocation8], 256   ;;  %p1903_p13 = pmov %p1902_p12 }
  0x7e   : > { %v412_v0 = vld [vmem:[%s341_s27] sm:$0xff]  ;;  %vm414_vm0 = vcmask 261120   ;;  %v1205_v3 = vld [vmem:[#allocation7 + $0x8] sm:$0xff]   ;;  %v1425_v4 = vmov 0.0   ;;  %vm1426_vm1 = vmmov 0   ;;  %v1206_v5 = vld [vmem:[#allocation7] sm:$0xff]   ;;  %v494_v22 = vlaneseq }
  0x7f   : > { %1374 = vsyncadd (%p1903_p13), [#allocation8], 4294967040  ;;  %v413_v1 = vmul.f32 %v412_v0, %v412_v0  ;;  %1055 = vmatprep.subr.bf16.mxu0 %v1425_v4  ;;  %1059 = vmatprep.mubr.msk.bf16.mxu0 %vm1426_vm1, %v1425_v4  ;;  %s1904_s4 = sld [smem:[#allocation25_spill]]  ;;  %v492_v15 = vld [vmem:[%s350_s26] sm:$0xff]  ;;  %s1427_s8 = smov 127   ;;  %vm516_vm2 = vcmask 252928  }
  0x80   : > { %1056 = vmatpush3.bf16.msra.mxu0 %v1205_v3  ;;  %s1428_s18 = smov 95   ;;  %s1429_s17 = smov 65   ;;  %v495_v23 = vand.u32 127, %v494_v22  ;;  %vm524_vm3 = vcmask 7168   ;;  %vm558_vm4 = vcmask 60416   ;;  %v493_v32 = vld [vmem:[%s359_s6] sm:$0xff] }
  0x81   : > { %v415_v2 = vsel %vm414_vm0, %v413_v1, 0.0  ;;  %1057 = vmatprep.subr.bf16.mxu0 %v1425_v4  ;;  %s1430_s19 = smov 32   ;;  %s1431_s24 = smov 97  }
  0x82   : > { %416 = vadd.xlane.f32.xlu0 %v415_v2  ;;  %s1432_s21 = smov 56   ;;  %s1433_s15 = smov 31   ;;  %v500_v26 = vand.u32 1, %v495_v23 }
  0x83   : > { %s1434_s30 = smov 1   ;;  %s1738_s20 = sshll.u32 %s1695_s25, 4 }
  0x84   : > { %1058 = vmatpush3.bf16.msra.mxu0 %v1206_v5  ;;  %vm1740_vm5 = vcmp.eq.s32.totalorder %v500_v26, 0  ;;  %s1749_s25 = scalar_lea.vmem [#allocation11], %s1738_s20  ;;  %s1435_s27 = smov 64  }
  0x85   : > { %v1025_v10 = vld [vmem:[%s1904_s4] ss:$0 sm:$0xff]  ;;  %s1436_s12 = smov 48   ;;  %s1437_s14 = smov 112  }
  0x86   : > { %s1438_s22 = smov 120   ;;  %s1763_s7 = scalar_lea.vmem [#allocation9], %s1738_s20 }
  0x87   : > { %s1439_s1 = smov 104   ;;  %s1440_s5 = smov 88  }
  0x88   : > { %s1441_s26 = smov 96   ;;  %s1442_s6 = smov 72  }
  0x89   : > { %s1443_s16 = smov 80   ;;  %s1444_s13 = smov 40  }
  0x8a   : > { %s404_s4 = scalar_lea.vmem [#allocation10], %s1738_s20 }
 0x10b   : > { %v417_v6 = vpop.xlane.xlu0 %416 }
 0x10c   : > { %v419_v7 = vmul.f32 0.03125, %v417_v6 }
 0x10e   : > { %v420_v8 = vadd.f32 1e-06, %v419_v7 }
 0x110   : > { %1207 = vrsqrt.f32 %v420_v8 }
 0x11d   : > { %v1208_v9 = vpop.eup %1207 }
 0x11e   : > { %v422_v11 = vmul.f32 %v1208_v9, %v412_v0 }
 0x120   : > { %v430_v12 = vmul.f32 %v1025_v10, %v422_v11 }
 0x122   : > { %v431_v13 = vpack.c.bf16 %v430_v12, %v430_v12 }
 0x124   : > { %1060 = vmatmul.mubr.msk.bf16.vlgmr.msra.gmra.mxu0 %vm414_vm0, %v431_v13 }
 0x1e4   : > { %v1722_v14 = vpop.f32.mrf.mxu0 }
 0x1e5   : > { %534 = vrot.lane.b32.xlu1 %v1722_v14, %s1427_s8  ;;  %531 = vrot.lane.b32.xlu0 %v1722_v14, %s1428_s18  ;;  %v491_v16 = vmul.f32 0.35355338, %v1722_v14  ;;  %v1733_v21 = vpack.c.bf16 %v1722_v14, %v1722_v14  ;;  %s1908_s18 = sld [smem:[#allocation17_spill]] (%p1643_p1) }
 0x1e6   : > { %v1061_v17 = vpop.f32.mrf.mxu0 }
 0x1e7   : > { %v527_v18 = vmul.f32 %v492_v15, %v491_v16 }
 0x1e8   : > { %v488_v19 = vpop.f32.mrf.mxu0 }
 0x1e9   : > { %538 = vrot.lane.b32.xlu1 %v1722_v14, %s1429_s17  ;;  %547 = vrot.lane.b32.xlu0 %v492_v15, %s1430_s19 }
 0x1ea   : > { %v1062_v20 = vpop.f32.mrf.mxu0 }
 0x1ed   : > { %541 = vrot.lane.b32.xlu1 %v1722_v14, %s1431_s24  ;;  %589 = vrot.lane.b32.xlu0 %v1733_v21, %s1432_s21 }
 0x1f1   : > { %510 = vrot.lane.b32.xlu1 %v491_v16, %s1427_s8  ;;  %s1907_s8 = sld [smem:[#allocation18_spill]] (%p1643_p1) }
 0x1f5   : > { %513 = vrot.lane.b32.xlu1 %v491_v16, %s1433_s15 }
 0x1f7   : > { %s1064_s17 = smul.u32 (%p1643_p1), 12, %s1907_s8 }
 0x1f9   : > { %518 = vrot.lane.b32.xlu1 %v491_v16, %s1431_s24 }
 0x1fd   : > { %521 = vrot.lane.b32.xlu1 %v491_v16, %s1434_s30  ;;  %s1909_s30 = sld [smem:[#allocation26_spill]] (%p1643_p1) }
 0x257   : > { %v535_v24 = vpop.permute.xlu1 %534  ;;  %v532_v25 = vpop.permute.xlu0 %531 }
 0x258   : > { %v537_v33 = vsel %vm516_vm2, %v532_v25, %v535_v24 }
 0x25b   : > { %v539_v27 = vpop.permute.xlu1 %538  ;;  %v548_v28 = vpop.permute.xlu0 %547 }
 0x25c   : > { %v550_v47 = vmul.f32 %v548_v28, %v1722_v14 }
 0x25f   : > { %v542_v30 = vpop.permute.xlu1 %541  ;;  %v590_v31 = vpop.permute.xlu0 %589 }
 0x260   : > { %v544_v34 = vsel %vm524_vm3, %v539_v27, %v542_v30  ;;  %1034 = vst.msk [vmem:[%s1749_s25 + $0x4] sm:$0xf] %vm558_vm4, %v590_v31 }
 0x261   : > { %v545_v35 = vsel %vm1740_vm5, %v537_v33, %v544_v34 }
 0x262   : > { %v551_v36 = vmul.f32 %v545_v35, %v493_v32 }
 0x263   : > { %v511_v37 = vpop.permute.xlu1 %510 }
 0x264   : > { %553 = vrot.lane.b32.xlu1 %v551_v36, %s1430_s19  ;;  %s640_s19 = sadd.s32 (%p1643_p1), %s1908_s18, %s1064_s17 }
 0x265   : > { %s1044_s24 = sshll.u32 (%p1643_p1), %s640_s19, 2 }
 0x266   : > { %s642_s20 = scalar_lea.vmem (%p1643_p1), %s1909_s30, %s1044_s24 }
 0x267   : > { %v514_v38 = vpop.permute.xlu1 %513 }
 0x268   : > { %572 = vrot.lane.b32.xlu1 %v1733_v21, %s1435_s27  ;;  %v517_v41 = vsel %vm516_vm2, %v511_v37, %v514_v38 }
 0x26b   : > { %v519_v39 = vpop.permute.xlu1 %518 }
 0x26c   : > { %604 = vrot.lane.b32.xlu1 %v1733_v21, %s1436_s12 }
 0x26f   : > { %v522_v40 = vpop.permute.xlu1 %521 }
 0x270   : > { %v525_v42 = vsel %vm524_vm3, %v519_v39, %v522_v40 }
 0x271   : > { %v526_v43 = vsel %vm1740_vm5, %v517_v41, %v525_v42 }
 0x272   : > { %v528_v44 = vmul.f32 %v526_v43, %v493_v32 }
 0x274   : > { %v529_v45 = vadd.f32 %v528_v44, %v527_v18 }
 0x276   : > { %v557_v46 = vpack.c.bf16 %v529_v45, %v529_v45 }
 0x278   : > { %594 = vrot.lane.b32.xlu1 %v557_v46, %s1437_s14  ;;  %579 = vrot.lane.b32.xlu0 %v557_v46, %s1438_s22  ;;  %559 = vst.msk [vmem:[%s1763_s7] sm:$0xf] %vm558_vm4, %v557_v46 }
 0x27c   : > { %609 = vrot.lane.b32.xlu0 %v557_v46, %s1439_s1 }
 0x27f   : > { %v659_v61 = vld [vmem:[%s1763_s7] sm:$0xf] (%p1643_p1) }
 0x280   : > { %660 = vst [vmem:[%s642_s20] sm:$0xf] (%p1643_p1), %v659_v61 }
 0x2d6   : > { %v554_v48 = vpop.permute.xlu1 %553 }
 0x2d7   : > { %v556_v49 = vadd.f32 %v554_v48, %v550_v47 }
 0x2d9   : > { %v1049_v50 = vpack.c.bf16 %v556_v49, %v556_v49 }
 0x2da   : > { %v573_v51 = vpop.permute.xlu1 %572 }
 0x2db   : > { %575 = vst.msk [vmem:[%s1749_s25] sm:$0xf] %vm558_vm4, %v573_v51  ;;  %584 = vrot.lane.b32.xlu1 %v1049_v50, %s1440_s5  ;;  %564 = vrot.lane.b32.xlu0 %v1049_v50, %s1441_s26 }
 0x2de   : > { %v605_v52 = vpop.permute.xlu1 %604 }
 0x2df   : > { %1037 = vst.msk [vmem:[%s1749_s25 + $0x8] sm:$0xf] %vm558_vm4, %v605_v52  ;;  %614 = vrot.lane.b32.xlu1 %v1049_v50, %s1442_s6  ;;  %599 = vrot.lane.b32.xlu0 %v1049_v50, %s1443_s16 }
 0x2e3   : > { %619 = vrot.lane.b32.xlu0 %v1733_v21, %s1444_s13 }
 0x2ea   : > { %v595_v53 = vpop.permute.xlu1 %594  ;;  %v580_v54 = vpop.permute.xlu0 %579 }
 0x2eb   : > { %1035 = vst.msk [vmem:[%s1763_s7 + $0x8] sm:$0xf] %vm558_vm4, %v595_v53  ;;  %1032 = vst.msk [vmem:[%s1763_s7 + $0x4] sm:$0xf] %vm558_vm4, %v580_v54 }
 0x2ee   : > { %v610_v55 = vpop.permute.xlu0 %609 }
 0x2ef   : > { %1038 = vst.msk [vmem:[%s1763_s7 + $0xc] sm:$0xf] %vm558_vm4, %v610_v55 }
 0x2f2   : > { %v661_v62 = vld [vmem:[%s1763_s7 + $0x4] sm:$0xf] (%p1643_p1)  ;;  %v663_v63 = vld [vmem:[%s1763_s7 + $0x8] sm:$0xf] (%p1643_p1) }
 0x2f3   : > { %662 = vst [vmem:[%s642_s20 + $0xc] sm:$0xf] (%p1643_p1), %v661_v62  ;;  %664 = vst [vmem:[%s642_s20 + $0x18] sm:$0xf] (%p1643_p1), %v663_v63 }
 0x2f6   : > { %v665_v0 = vld [vmem:[%s1763_s7 + $0xc] sm:$0xf] (%p1643_p1) }
 0x2f7   : > { %666 = vst [vmem:[%s642_s20 + $0x24] sm:$0xf] (%p1643_p1), %v665_v0 }
 0x34d   : > { %v585_v56 = vpop.permute.xlu1 %584  ;;  %v565_v57 = vpop.permute.xlu0 %564 }
 0x34e   : > { %1033 = vst.msk [vmem:[%s404_s4 + $0x4] sm:$0xf] %vm558_vm4, %v585_v56  ;;  %567 = vst.msk [vmem:[%s404_s4] sm:$0xf] %vm558_vm4, %v565_v57 }
 0x351   : > { %v615_v58 = vpop.permute.xlu1 %614  ;;  %v600_v59 = vpop.permute.xlu0 %599 }
 0x352   : > { %1039 = vst.msk [vmem:[%s404_s4 + $0xc] sm:$0xf] %vm558_vm4, %v615_v58  ;;  %1036 = vst.msk [vmem:[%s404_s4 + $0x8] sm:$0xf] %vm558_vm4, %v600_v59  ;;  %638 = sbr.rel (!%p1643_p1) target bundleno = 855 (0x357), region = 60 }
 0x355   : > { %v620_v60 = vpop.permute.xlu0 %619 }
 0x356   : > { %1040 = vst.msk [vmem:[%s1749_s25 + $0xc] sm:$0xf] %vm558_vm4, %v620_v60 }
 0x357 PF: > { %698 = sbr.rel (!%p1643_p1) target bundleno = 868 (0x364), region = 101  ;;  %s1910_s27 = sld [smem:[#allocation18_spill]] (%p1643_p1)  ;;  %v719_v1 = vld [vmem:[%s404_s4] sm:$0xf] (%p1643_p1)  ;;  %v721_v2 = vld [vmem:[%s404_s4 + $0x4] sm:$0xf] (%p1643_p1) }
 0x358   : > { %s1911_s12 = sld [smem:[#allocation17_spill]] (%p1643_p1) }
 0x359   : > { %v723_v3 = vld [vmem:[%s404_s4 + $0x8] sm:$0xf] (%p1643_p1)  ;;  %v725_v4 = vld [vmem:[%s404_s4 + $0xc] sm:$0xf] (%p1643_p1)  ;;  %s1912_s26 = sld [smem:[#allocation27_spill]] (%p1643_p1) }
 0x35d   : > { %s1065_s14 = smul.u32 12, %s1910_s27 }
 0x35f   : > { %s700_s22 = sadd.s32 %s1911_s12, %s1065_s14 }
 0x360   : > { %s1045_s7 = sshll.u32 %s700_s22, 2 }
 0x361   : > { %s702_s6 = scalar_lea.vmem %s1912_s26, %s1045_s7 }
 0x362   : > { %720 = vst [vmem:[%s702_s6] sm:$0xf] %v719_v1  ;;  %722 = vst [vmem:[%s702_s6 + $0xc] sm:$0xf] %v721_v2 }
 0x363   : > { %724 = vst [vmem:[%s702_s6 + $0x18] sm:$0xf] %v723_v3  ;;  %726 = vst [vmem:[%s702_s6 + $0x24] sm:$0xf] %v725_v4 }
 0x364 PF: > { %758 = sbr.rel (!%p1643_p1) target bundleno = 881 (0x371), region = 142  ;;  %s1913_s16 = sld [smem:[#allocation18_spill]] (%p1643_p1)  ;;  %v779_v5 = vld [vmem:[%s1749_s25] sm:$0xf] (%p1643_p1)  ;;  %v781_v6 = vld [vmem:[%s1749_s25 + $0x4] sm:$0xf] (%p1643_p1) }
 0x365   : > { %s1914_s13 = sld [smem:[#allocation17_spill]] (%p1643_p1)  ;;  %v783_v7 = vld [vmem:[%s1749_s25 + $0x8] sm:$0xf] (%p1643_p1)  ;;  %v785_v8 = vld [vmem:[%s1749_s25 + $0xc] sm:$0xf] (%p1643_p1) }
 0x366   : > { %s1915_s24 = sld [smem:[#allocation28_spill]] (%p1643_p1) }
 0x36a   : > { %s1066_s4 = smul.u32 12, %s1913_s16 }
 0x36c   : > { %s760_s8 = sadd.s32 %s1914_s13, %s1066_s4 }
 0x36d   : > { %s1046_s18 = sshll.u32 %s760_s8, 2 }
 0x36e   : > { %s762_s21 = scalar_lea.vmem %s1915_s24, %s1046_s18 }
 0x36f   : > { %780 = vst [vmem:[%s762_s21] sm:$0xf] %v779_v5  ;;  %782 = vst [vmem:[%s762_s21 + $0xc] sm:$0xf] %v781_v6 }
 0x370   : > { %784 = vst [vmem:[%s762_s21 + $0x18] sm:$0xf] %v783_v7  ;;  %786 = vst [vmem:[%s762_s21 + $0x24] sm:$0xf] %v785_v8 }
 0x371 PF: > { %s25_s11 = sadd.s32 1, %s1417_s11   ;;  %s1916_s24 = sld [smem:[#allocation15_spill]] }
 0x372   : > { %p22_p1 = scmp.ge.s32.totalorder %s25_s11, 8   ;;  %s1917_s25 = sld [smem:[#allocation16_spill]] }
 0x373   : > { %s1918_s26 = sld [smem:[#allocation20_spill]]  ;;  %s1921_s27 = smov %s1393_s28 }
 0x374   : > { %s1919_s23 = sld [smem:[#allocation19_spill]]  ;;  %s1922_s28 = smov %s1397_s29 }
 0x375   : > { %s1920_s15 = sld [smem:[#allocation22_spill]]  ;;  %s1923_s29 = smov %s1653_s3 }
 0x376   : > { %s1924_s30 = smov %s1409_s9  ;;  %s1925_s8 = smov %s1413_s10 }
 0x377   :  { %24 = sbr.rel (!%p22_p1) target bundleno = 17 (0x11), region = 264 }
 0x37a   : > { %s1926_s9 = smov %s1919_s23 }
 0x37b   : > { %s1927_s10 = smov %s1920_s15 }
 0x37c   :  { %842 = vsyncpa [#allocation3], 1 }
 0x37d   :  { %844 = vsyncpa [#allocation3 + $0x1], 1 }
 0x37e   :  { %845 = vsyncpa [#allocation5], 1 }
 0x37f   :  { %847 = vsyncpa [#allocation5 + $0x1], 1 }
 0x380   :  { %848 = vsyncpa [#allocation8], 1 }

</bundles_post_ra>
